<compile_context>
chip_gen: v5e
topology: v5e:2x2
jax: 0.10.0
libtpu: 0.0.40
codegen_flags: <defaults>
</compile_context>

<pallas_src>
import functools
import math

import jax
import jax.numpy as jnp
from jax.experimental import pallas as pl
from jax.experimental.pallas import tpu as pltpu


# --------------------------------------------------------------------------------------
# Pallas kernel
# --------------------------------------------------------------------------------------
def _fused_lrelu_kernel(x_ref, b_ref, o_ref, *, negative_slope, scale):
    """One (tm, tn) tile of the flattened (B*C, H*W) feature map.

    x_ref: (tm, tn) activations
    b_ref: (tm, 1)  per-row (== per-channel) bias, lane-broadcast by the VPU
    """
    v = x_ref[...] + b_ref[...]
    o_ref[...] = (jnp.where(v >= 0.0, v, negative_slope * v) * scale).astype(o_ref.dtype)


# --------------------------------------------------------------------------------------
# Wrapper
# --------------------------------------------------------------------------------------
def _block_dim(dim, target, align):
    """Full extent if it already fits, else the largest aligned tile <= target."""
    if dim <= target:
        return dim
    return max(align, (target // align) * align)


def fused_leaky_relu(x, bias, negative_slope=0.2, scale=math.sqrt(2.0)):
    """Pallas TPU equivalent of  F.leaky_relu(x + bias, negative_slope) * scale.

    x    : (B, C, H, W) float32 (NCHW, as in the PyTorch module)
    bias : per-channel bias, shape (1, C, 1, 1) or (C,)
    """
    B, C, H, W = x.shape
    M, N = B * C, H * W

    # Pure reshapes / tiny broadcast -- no feature-map data movement in HBM.
    x2 = x.reshape(M, N)
    bias_rows = jnp.broadcast_to(
        jnp.reshape(bias, (1, C)).astype(x.dtype), (B, C)
    ).reshape(M, 1)

    # Tile selection: rows on sublanes (align 8), spatial H*W on lanes (align 128).
    tm = _block_dim(M, 256, 8)
    tn = _block_dim(N, 2048, 128)
    grid = (pl.cdiv(M, tm), pl.cdiv(N, tn))

    out = pl.pallas_call(
        functools.partial(
            _fused_lrelu_kernel, negative_slope=negative_slope, scale=scale
        ),
        out_shape=jax.ShapeDtypeStruct((M, N), x.dtype),
        grid=grid,
        in_specs=[
            pl.BlockSpec((tm, tn), lambda i, j: (i, j)),   # activation tile
            pl.BlockSpec((tm, 1), lambda i, j: (i, 0)),    # per-row bias column
        ],
        out_specs=pl.BlockSpec((tm, tn), lambda i, j: (i, j)),
        compiler_params=pltpu.CompilerParams(
            dimension_semantics=("parallel", "parallel")
        ),
    )(x2, bias_rows)

    return out.reshape(B, C, H, W)


# --------------------------------------------------------------------------------------
# Self-test
# --------------------------------------------------------------------------------------
if __name__ == "__main__":
    key = jax.random.PRNGKey(0)
    kx, kb = jax.random.split(key)

    B, C, H, W = 2, 4, 16, 16
    x = jax.random.normal(kx, (B, C, H, W), jnp.float32)
    # nn.Parameter shape in the PyTorch module is (1, channel, 1, 1); use non-zero
    # values so the per-channel broadcast is actually exercised.
    bias = 0.1 * jax.random.normal(kb, (1, C, 1, 1), jnp.float32)

    fwd = jax.jit(fused_leaky_relu)
    out = fwd(x, bias)
    jax.block_until_ready(out)

    # Reference (plain jnp) check of the PyTorch semantics.
    v = x + bias
    ref = jnp.where(v >= 0.0, v, 0.2 * v) * math.sqrt(2.0)

    assert out.shape == (B, C, H, W), out.shape
    assert bool(jnp.all(jnp.isfinite(out)))
    assert bool(jnp.allclose(out, ref, atol=1e-5, rtol=1e-5))
    print("KERNEL_OK")
</pallas_src>

<mosaic_0001>
module attributes {stable_mosaic.version = 11 : i64} {
  func.func @_fused_lrelu_kernel(%arg0: i32, %arg1: i32, %arg2: memref<8x256xf32, #tpu.memory_space<vmem>>, %arg3: memref<8x1xf32, #tpu.memory_space<vmem>>, %arg4: memref<8x256xf32, #tpu.memory_space<vmem>>) attributes {dimension_semantics = [#tpu.dimension_semantics<parallel>, #tpu.dimension_semantics<parallel>], iteration_bounds = array<i64: 1, 1>, scalar_prefetch = 0 : i64, scratch_operands = 0 : i64, tpu.core_type = #tpu.core_type<tc>, window_params = [{transform_indices = @transform_0, window_bounds = array<i64: 8, 256>}, {transform_indices = @transform_1, window_bounds = array<i64: 8, 1>}, {transform_indices = @transform_2, window_bounds = array<i64: 8, 256>}]} {
    %c0 = arith.constant 0 : index
    %c0_0 = arith.constant 0 : index
    %0 = vector.load %arg2[%c0, %c0_0] : memref<8x256xf32, #tpu.memory_space<vmem>>, vector<8x256xf32>
    %c0_1 = arith.constant 0 : index
    %c0_2 = arith.constant 0 : index
    %1 = vector.load %arg3[%c0_1, %c0_2] : memref<8x1xf32, #tpu.memory_space<vmem>>, vector<8x1xf32>
    %2 = vector.broadcast %1 : vector<8x1xf32> to vector<8x256xf32>
    %3 = arith.addf %0, %2 : vector<8x256xf32>
    %cst = arith.constant 0.000000e+00 : f32
    %4 = vector.broadcast %cst : f32 to vector<8x256xf32>
    %5 = arith.cmpf oge, %3, %4 : vector<8x256xf32>
    %cst_3 = arith.constant 2.000000e-01 : f32
    %6 = vector.broadcast %cst_3 : f32 to vector<8x256xf32>
    %7 = arith.mulf %6, %3 : vector<8x256xf32>
    %8 = arith.select %5, %3, %7 : vector<8x256xi1>, vector<8x256xf32>
    %cst_4 = arith.constant 1.41421354 : f32
    %9 = vector.broadcast %cst_4 : f32 to vector<8x256xf32>
    %10 = arith.mulf %8, %9 : vector<8x256xf32>
    %c0_5 = arith.constant 0 : index
    %c0_6 = arith.constant 0 : index
    %11 = vector.load %arg4[%c0_5, %c0_6] : memref<8x256xf32, #tpu.memory_space<vmem>>, vector<8x256xf32>
    tpu.vector_store %arg4[%c0_5, %c0_6], %10 {strides = array<i32>} : memref<8x256xf32, #tpu.memory_space<vmem>>, vector<8x256xf32>,
    return
  }
  func.func @transform_0(%arg0: i32, %arg1: i32) -> (i32, i32) {
    %c0_i32 = arith.constant 0 : i32
    return %arg0, %arg1 : i32, i32
  }
  func.func @transform_1(%arg0: i32, %arg1: i32) -> (i32, i32) {
    %c0_i32 = arith.constant 0 : i32
    %c0_i32_0 = arith.constant 0 : i32
    return %arg0, %c0_i32 : i32, i32
  }
  func.func @transform_2(%arg0: i32, %arg1: i32) -> (i32, i32) {
    %c0_i32 = arith.constant 0 : i32
    return %arg0, %arg1 : i32, i32
  }
}

</mosaic_0001>

<bundles_post_ra>
// kernel: fused_leaky_relu.1
= control target key start
LH: loop header
LB: loop body
LE: loop exit
PB: predicated region body
PF: predicated region fallthrough
CT: control target
= control target key end

     0   :  { %v37_v0 = vmov 0   ;;  %s68_s1 = inlined_call_operand.vmem [shape: f32[8,1], index: 1, kind: input, shape index: {}]   ;;  %s69_s0 = inlined_call_operand.vmem [shape: f32[8,256], index: 0, kind: input, shape index: {}]   ;;  %s70_s2 = inlined_call_operand.vmem [shape: f32[8,256], index: 2, kind: output, shape index: {}]  }
   0x1   :  { %36 = vset.pattern.permute.xlu0 %v37_v0  ;;  %v13_v1 = vld [vmem:[%s68_s1] sm:$0xff]  ;;  %v12_v3 = vld [vmem:[%s69_s0 + $0x8] sm:$0xff] }
   0x2   :  { %16 = vperm.xlu0 %36, %v13_v1   ;;  %v11_v2 = vld [vmem:[%s69_s0] sm:$0xff] }
  0x74   :  { %v17_v4 = vpop.permute.xlu0 %16 }
  0x75   :  { %v19_v5 = vadd.f32 %v17_v4, %v11_v2  ;;  %v20_v6 = vadd.f32 %v17_v4, %v12_v3 }
  0x77   :  { %vm21_vm0 = vcmp.ge.f32.partialorder %v19_v5, 0.0  ;;  %vm22_vm1 = vcmp.ge.f32.partialorder %v20_v6, 0.0  ;;  %v23_v7 = vmul.f32 0.2, %v19_v5  ;;  %v24_v8 = vmul.f32 0.2, %v20_v6 }
  0x79   :  { %v25_v9 = vsel %vm21_vm0, %v19_v5, %v23_v7  ;;  %v26_v10 = vsel %vm22_vm1, %v20_v6, %v24_v8 }
  0x7a   :  { %v27_v11 = vmul.f32 1.4142135, %v25_v9  ;;  %v28_v12 = vmul.f32 1.4142135, %v26_v10 }
  0x7c   :  { %29 = vst [vmem:[%s70_s2] sm:$0xff] %v27_v11 }
  0x7d   :  { %30 = vst [vmem:[%s70_s2 + $0x8] sm:$0xff] %v28_v12 }

</bundles_post_ra>
